<compile_context>
chip_gen: v5e
topology: v5e:2x2
jax: 0.10.0
libtpu: 0.0.40
codegen_flags: <defaults>
</compile_context>

<pallas_src>
import math

import jax
import jax.numpy as jnp
from jax.experimental import pallas as pl
from jax.experimental.pallas import tpu as pltpu


def _round_up(x, m):
    return ((x + m - 1) // m) * m


def ecg_copy_listener_kernel(feats_ref, wfeat_ref, bfeat_ref, msg_ref, scores_ref):
    """One batch-tile of the forward pass.

    feats_ref  : (TM, d_in)        flattened image features (TM = TB * n_obj)
    wfeat_ref  : (d_in, feat_pad)  bf16 Linear weight (resident)
    bfeat_ref  : (1, feat_pad)     f32 Linear bias    (resident)
    msg_ref    : (TB, feat_pad)    f32 bilinear(message), one row per batch row
    scores_ref : (TB, n_obj)       f32 output scores
    """
    tm = feats_ref.shape[0]
    tb, feat_pad = msg_ref.shape
    n_obj = tm // tb

    # feat_model: flatten -> Linear -> ReLU.  Cast feats to bf16 in VMEM (free
    # VPU work under DMA slack) so the MXU runs bf16 with f32 accumulation.
    emb = jnp.dot(feats_ref[...].astype(jnp.bfloat16), wfeat_ref[...],
                  preferred_element_type=jnp.float32)            # (TM, feat_pad)
    emb = jnp.maximum(emb + bfeat_ref[...], 0.0)
    # dropout: identity (eval mode)

    # compare(): einsum('ijh,ih->ij') -- broadcast the per-batch message over
    # the n_obj objects of that batch row and reduce over the feature axis.
    emb3 = emb.reshape(tb, n_obj, feat_pad)
    msg3 = msg_ref[...].reshape(tb, 1, feat_pad)
    scores_ref[...] = jnp.sum(emb3 * msg3, axis=-1)              # (TB, n_obj)


def ecg_copy_listener_forward(feats, message, w_feat, b_feat, w_bil):
    """feats: (B, n_obj, C, H, W); message: (B, d_model) -> scores (B, n_obj)."""
    B, n_obj = feats.shape[0], feats.shape[1]
    d_in = math.prod(feats.shape[2:])
    feat_size = w_feat.shape[1]
    M = B * n_obj

    # self.bilinear(message): one tiny XLA matmul per batch row.  It is NOT
    # repeated per object in HBM; the kernel broadcasts it over n_obj in VMEM.
    msg_enc = message.astype(jnp.float32) @ w_bil.astype(jnp.float32)    # (B, feat)

    # One-time parameter prep (tiny tensors): zero-pad the feature axis to a
    # full 128-lane width.  Exact: relu(0 + 0) * 0 contributes nothing.
    feat_pad = _round_up(feat_size, 128)
    w_feat_p = jnp.zeros((d_in, feat_pad), jnp.bfloat16).at[:, :feat_size].set(
        w_feat.astype(jnp.bfloat16))
    b_feat_p = jnp.zeros((1, feat_pad), jnp.float32).at[:, :feat_size].set(
        b_feat.reshape(1, feat_size).astype(jnp.float32))
    msg_p = jnp.zeros((B, feat_pad), jnp.float32).at[:, :feat_size].set(msg_enc)

    # Dominant tensor: streamed straight from HBM.  No wrapper cast / pad /
    # repeat (each of those is an extra full HBM pass on a mem-bound kernel).
    feats_flat = feats.reshape(M, d_in)
    in_elem = feats_flat.dtype.itemsize

    # ---- tile-size / VMEM-budget selection ----------------------------------
    try:  # per-TensorCore VMEM: 128 MiB on v5e/v6e, 64 MiB on v7x
        vmem_cap = int(pltpu.get_tpu_info().vmem_capacity_bytes)
    except Exception:
        vmem_cap = 64 << 20
    vmem_budget = (vmem_cap * 3) // 4       # headroom for Mosaic internal scratch

    ALIGN = 8                               # sublane alignment of the msg tile
    row_bytes = n_obj * d_in * in_elem      # feats bytes per batch row
    target_tile_bytes = min(8 << 20, vmem_budget // 4)
    tb_budget = max(1, target_tile_bytes // row_bytes)
    if B <= ALIGN:
        TB = B                              # one full block (blocks == array dims)
    else:
        # cap at ceil(B/2) so there are >= 2 grid steps (keeps both v7x TCs busy)
        TB = max(ALIGN, min((tb_budget // ALIGN) * ALIGN,
                            _round_up(pl.cdiv(B, 2), ALIGN)))
    TM = TB * n_obj
    grid = (pl.cdiv(B, TB),)
    # TODO(synk): for very large image encoders (d_in in the tens of thousands)
    # add a K grid axis over d_in with an f32 accumulator scratch instead of a
    # single (TM, d_in) strip per step.

    vmem_needed = (2 * TM * d_in * in_elem               # feats (double-buffered)
                   + 2 * d_in * feat_pad * 2             # w_feat (bf16)
                   + 2 * 8 * feat_pad * 4                # bias (sublane-padded)
                   + 2 * max(TB, 8) * feat_pad * 4       # msg
                   + 2 * max(TB, 8) * 128 * 4)           # scores block (lane-padded)
    vmem_limit = int(min(vmem_budget, max(vmem_needed + (4 << 20), 16 << 20)))

    cost = pl.CostEstimate(
        flops=2 * M * d_in * feat_pad + 3 * M * feat_pad,
        transcendentals=0,
        bytes_accessed=(M * d_in * in_elem + d_in * feat_pad * 2
                        + B * feat_pad * 4 + feat_pad * 4 + M * 4),
    )

    scores = pl.pallas_call(
        ecg_copy_listener_kernel,
        out_shape=jax.ShapeDtypeStruct((B, n_obj), jnp.float32),
        grid=grid,
        in_specs=[
            pl.BlockSpec((TM, d_in), lambda i: (i, 0)),          # feats: streamed
            pl.BlockSpec((d_in, feat_pad), lambda i: (0, 0)),    # weight: resident
            pl.BlockSpec((1, feat_pad), lambda i: (0, 0)),       # bias: resident
            pl.BlockSpec((TB, feat_pad), lambda i: (i, 0)),      # msg: streamed
        ],
        out_specs=pl.BlockSpec((TB, n_obj), lambda i: (i, 0)),
        compiler_params=pltpu.CompilerParams(
            dimension_semantics=("parallel",),
            vmem_limit_bytes=vmem_limit,
        ),
        cost_estimate=cost,
    )(feats_flat, w_feat_p, b_feat_p, msg_p)

    return scores


def _reference_forward(feats, message, w_feat, b_feat, w_bil):
    B, n_obj = feats.shape[0], feats.shape[1]
    d_in = math.prod(feats.shape[2:])
    emb = jax.nn.relu(feats.reshape(B * n_obj, d_in) @ w_feat + b_feat)
    emb = emb.reshape(B, n_obj, -1)
    msg_enc = message @ w_bil
    return jnp.einsum('ijh,ih->ij', emb, msg_enc)


if __name__ == "__main__":
    # Small shapes consistent with the module's forward:
    #   feats   : (batch, n_obj, C, H, W);  message : (batch, d_model)
    B, n_obj, C, H, W = 2, 4, 3, 16, 16
    d_model, feat_size = 16, 32
    d_in = C * H * W

    key = jax.random.PRNGKey(0)
    k_feats, k_msg, k_wf, k_bf, k_wb = jax.random.split(key, 5)

    feats = jax.random.normal(k_feats, (B, n_obj, C, H, W), dtype=jnp.float32)
    message = jax.random.normal(k_msg, (B, d_model), dtype=jnp.float32)

    # Deterministic synthetic parameters (torch Linear weights, pre-transposed).
    w_feat = jax.random.normal(k_wf, (d_in, feat_size), dtype=jnp.float32) * 0.05
    b_feat = jax.random.normal(k_bf, (feat_size,), dtype=jnp.float32) * 0.05
    w_bil = jax.random.normal(k_wb, (d_model, feat_size), dtype=jnp.float32) * 0.1

    scores = ecg_copy_listener_forward(feats, message, w_feat, b_feat, w_bil)
    scores = jax.block_until_ready(scores)

    ref = _reference_forward(feats, message, w_feat, b_feat, w_bil)
    assert scores.shape == (B, n_obj)
    # bf16 matmul inputs (f32 accumulation) -> slightly looser tolerance.
    assert jnp.allclose(scores, ref, atol=5e-2, rtol=2e-2), (scores, ref)

    print("KERNEL_OK")
</pallas_src>

<mosaic_0001>
module attributes {stable_mosaic.version = 11 : i64} {
  func.func @ecg_copy_listener_kernel(%arg0: i32, %arg1: memref<8x768xf32, #tpu.memory_space<vmem>>, %arg2: memref<768x128xbf16, #tpu.memory_space<vmem>>, %arg3: memref<1x128xf32, #tpu.memory_space<vmem>>, %arg4: memref<2x128xf32, #tpu.memory_space<vmem>>, %arg5: memref<2x4xf32, #tpu.memory_space<vmem>>) attributes {dimension_semantics = [#tpu.dimension_semantics<parallel>], iteration_bounds = array<i64: 1>, scalar_prefetch = 0 : i64, scratch_operands = 0 : i64, tpu.core_type = #tpu.core_type<tc>, window_params = [{transform_indices = @transform_0, window_bounds = array<i64: 8, 768>}, {pipeline_mode = #tpu.pipeline_mode<synchronous>, transform_indices = @transform_1, window_bounds = array<i64: 768, 128>}, {pipeline_mode = #tpu.pipeline_mode<synchronous>, transform_indices = @transform_2, window_bounds = array<i64: 1, 128>}, {transform_indices = @transform_3, window_bounds = array<i64: 2, 128>}, {transform_indices = @transform_4, window_bounds = array<i64: 2, 4>}]} {
    %c0 = arith.constant 0 : index
    %c0_0 = arith.constant 0 : index
    %0 = vector.load %arg1[%c0, %c0_0] : memref<8x768xf32, #tpu.memory_space<vmem>>, vector<8x768xf32>
    %1 = arith.truncf %0 : vector<8x768xf32> to vector<8x768xbf16>
    %c0_1 = arith.constant 0 : index
    %c0_2 = arith.constant 0 : index
    %2 = vector.load %arg2[%c0_1, %c0_2] : memref<768x128xbf16, #tpu.memory_space<vmem>>, vector<768x128xbf16>
    %cst = arith.constant dense<0.000000e+00> : vector<8x128xf32>
    %3 = tpu.matmul %1, %2, %cst {dimension_numbers = #tpu.dot_dimension_numbers<[1], [0], [0], [1], [0, 0, 1, 1], [], []>} : vector<8x768xbf16>, vector<768x128xbf16>, vector<8x128xf32> -> vector<8x128xf32>
    %c0_3 = arith.constant 0 : index
    %c0_4 = arith.constant 0 : index
    %4 = vector.load %arg3[%c0_3, %c0_4] : memref<1x128xf32, #tpu.memory_space<vmem>>, vector<1x128xf32>
    %5 = vector.broadcast %4 : vector<1x128xf32> to vector<8x128xf32>
    %6 = arith.addf %3, %5 : vector<8x128xf32>
    %cst_5 = arith.constant 0.000000e+00 : f32
    %7 = vector.broadcast %cst_5 : f32 to vector<8x128xf32>
    %8 = arith.maximumf %6, %7 : vector<8x128xf32>
    %9 = vector.shape_cast %8 : vector<8x128xf32> to vector<2x4x128xf32>
    %c0_6 = arith.constant 0 : index
    %c0_7 = arith.constant 0 : index
    %10 = vector.load %arg4[%c0_6, %c0_7] : memref<2x128xf32, #tpu.memory_space<vmem>>, vector<2x128xf32>
    %11 = vector.shape_cast %10 : vector<2x128xf32> to vector<2x1x128xf32>
    %12 = vector.broadcast %11 : vector<2x1x128xf32> to vector<2x4x128xf32>
    %13 = arith.mulf %9, %12 : vector<2x4x128xf32>
    %cst_8 = arith.constant dense<0.000000e+00> : vector<2x4xf32>
    %14 = vector.multi_reduction <add>, %13, %cst_8 [2] : vector<2x4x128xf32> to vector<2x4xf32>
    %c0_9 = arith.constant 0 : index
    %c0_10 = arith.constant 0 : index
    %15 = vector.load %arg5[%c0_9, %c0_10] : memref<2x4xf32, #tpu.memory_space<vmem>>, vector<2x4xf32>
    tpu.vector_store %arg5[%c0_9, %c0_10], %14 {strides = array<i32>} : memref<2x4xf32, #tpu.memory_space<vmem>>, vector<2x4xf32>,
    return
  }
  func.func @transform_0(%arg0: i32) -> (i32, i32) {
    %c0_i32 = arith.constant 0 : i32
    %c0_i32_0 = arith.constant 0 : i32
    return %arg0, %c0_i32 : i32, i32
  }
  func.func @transform_1(%arg0: i32) -> (i32, i32) {
    %c0_i32 = arith.constant 0 : i32
    %c0_i32_0 = arith.constant 0 : i32
    %c0_i32_1 = arith.constant 0 : i32
    return %c0_i32, %c0_i32_0 : i32, i32
  }
  func.func @transform_2(%arg0: i32) -> (i32, i32) {
    %c0_i32 = arith.constant 0 : i32
    %c0_i32_0 = arith.constant 0 : i32
    %c0_i32_1 = arith.constant 0 : i32
    return %c0_i32, %c0_i32_0 : i32, i32
  }
  func.func @transform_3(%arg0: i32) -> (i32, i32) {
    %c0_i32 = arith.constant 0 : i32
    %c0_i32_0 = arith.constant 0 : i32
    return %arg0, %c0_i32 : i32, i32
  }
  func.func @transform_4(%arg0: i32) -> (i32, i32) {
    %c0_i32 = arith.constant 0 : i32
    %c0_i32_0 = arith.constant 0 : i32
    return %arg0, %c0_i32 : i32, i32
  }
}

</mosaic_0001>

<bundles_post_ra>
// kernel: tpu_custom_call.1
= control target key start
LH: loop header
LB: loop body
LE: loop exit
PB: predicated region body
PF: predicated region fallthrough
CT: control target
= control target key end

     0   :  { %9 = vsyncpa [#allocation3], 0  ;;  %s983_s0 = inlined_call_operand.hbm [shape: f32[8,768], index: 0, kind: input, shape index: {}]   ;;  %s984_s1 = inlined_call_operand.hbm [shape: bf16[768,128], index: 1, kind: input, shape index: {}]   ;;  %s985_s2 = inlined_call_operand.hbm [shape: f32[1,128], index: 2, kind: input, shape index: {}]   ;;  %s986_s3 = inlined_call_operand.vmem [shape: f32[2,128], index: 3, kind: input, shape index: {}]   ;;  %s987_s4 = inlined_call_operand.hbm [shape: f32[2,4], index: 4, kind: output, shape index: {}]  }
   0x1   :  { %10 = vsyncpa [#allocation6], 0  ;;  %s27_s17 = sshll.u32 %s984_s1, 4  ;;  %s28_s17 = int_to_ptr.hbm [resolvable:$true] %s27_s17 }
   0x2   :  { %11 = vsyncpa [#allocation4], 0  ;;  %s937_s18 = smov [#allocation5]   ;;  %s17_s22 = sshll.u32 %s983_s0, 4  ;;  %s18_s22 = int_to_ptr.hbm [resolvable:$true] %s17_s22 }
   0x3   :  { %s29_s19 = sshll.u32 %s937_s18, 4  ;;  %s938_s23 = smov 64   ;;  %s30_s19 = int_to_ptr.vmem [resolvable:$true] %s29_s19 }
   0x4   :  { %s939_s24 = smov 4   ;;  %s940_s25 = smov [#allocation2]  }
   0x5   :  { %35 = dma.hbm_to_vmem [thread:$0]  %s28_s17, 6144, %s30_s19, [#allocation6], %s938_s23, %s938_s23, %s939_s24  }
   0x6   :  { %s19_s26 = sshll.u32 %s940_s25, 4  ;;  %s41_s29 = sshll.u32 %s985_s2, 4  ;;  %s20_s26 = int_to_ptr.vmem [resolvable:$true] %s19_s26  ;;  %s42_s29 = int_to_ptr.hbm [resolvable:$true] %s41_s29 }
   0x7   :  { %22 = dma.hbm_to_vmem [thread:$0]  %s18_s22, 768, %s20_s26, [#allocation3]  }
   0x8   :  { %s941_s1 = smov [#allocation7]  }
   0x9   :  { %s43_s30 = sshll.u32 %s941_s1, 4  ;;  %s44_s30 = int_to_ptr.vmem [resolvable:$true] %s43_s30 }
   0xa   :  { %46 = dma.hbm_to_vmem [thread:$0]  %s42_s29, 16, %s44_s30, [#allocation6]  }
   0xb   :  { %931 = dma.done.wait [#allocation3], 768  }
   0xc   :  { %932 = vsyncadd [#allocation3], 4294966528 }
   0xd   :  { %933 = dma.done.wait [#allocation6], 6160  }
   0xe   :  { %934 = vsyncadd [#allocation6], 4294961136  ;;  %v787_v0 = vld [vmem:[#allocation5 + $0x38] sm:$0xff]  ;;  %v786_v2 = vld [vmem:[#allocation5 + $0x30] sm:$0xff]  ;;  %vm552_vm0 = vcmask 1043456   ;;  %s577_s8 = sshll.u32 %s987_s4, 4  ;;  %s578_s8 = int_to_ptr.hbm [resolvable:$true] %s577_s8 }
   0xf   :  { %v795_v1 = vld [vmem:[#allocation5 + $0x78] sm:$0xff]  ;;  %461 = vmatpush.bf16.msra.mxu0 %v787_v0  ;;  %v794_v3 = vld [vmem:[#allocation5 + $0x70] sm:$0xff]  ;;  %v785_v8 = vld [vmem:[#allocation5 + $0x28] sm:$0xff]  ;;  %vm565_vm1 = vcmask 1041409   ;;  %vm568_vm2 = vcmask 25600  }
  0x10   :  { %474 = vmatpush.bf16.msra.mxu1 %v795_v1  ;;  %v803_v4 = vld [vmem:[#allocation5 + $0xb8] sm:$0xff]  ;;  %v802_v6 = vld [vmem:[#allocation5 + $0xb0] sm:$0xff]  ;;  %v793_v9 = vld [vmem:[#allocation5 + $0x68] sm:$0xff] }
  0x11   :  { %v811_v5 = vld [vmem:[#allocation5 + $0xf8] sm:$0xff]  ;;  %487 = vmatpush.bf16.msra.mxu2 %v803_v4  ;;  %v810_v7 = vld [vmem:[#allocation5 + $0xf0] sm:$0xff]  ;;  %v801_v10 = vld [vmem:[#allocation5 + $0xa8] sm:$0xff] }
  0x12   :  { %500 = vmatpush.bf16.msra.mxu3 %v811_v5  ;;  %v809_v11 = vld [vmem:[#allocation5 + $0xe8] sm:$0xff]  ;;  %v784_v12 = vld [vmem:[#allocation5 + $0x20] sm:$0xff]  ;;  %v783_v16 = vld [vmem:[#allocation5 + $0x18] sm:$0xff] }
  0x13   :  { %462 = vmatpush.bf16.msra.mxu0 %v786_v2  ;;  %v792_v13 = vld [vmem:[#allocation5 + $0x60] sm:$0xff]  ;;  %v791_v17 = vld [vmem:[#allocation5 + $0x58] sm:$0xff]  ;;  %v782_v20 = vld [vmem:[#allocation5 + $0x10] sm:$0xff] }
  0x14   :  { %475 = vmatpush.bf16.msra.mxu1 %v794_v3  ;;  %v800_v14 = vld [vmem:[#allocation5 + $0xa0] sm:$0xff]  ;;  %v799_v18 = vld [vmem:[#allocation5 + $0x98] sm:$0xff]  ;;  %v790_v21 = vld [vmem:[#allocation5 + $0x50] sm:$0xff] }
  0x15   :  { %488 = vmatpush.bf16.msra.mxu2 %v802_v6  ;;  %v808_v15 = vld [vmem:[#allocation5 + $0xe0] sm:$0xff]  ;;  %v807_v19 = vld [vmem:[#allocation5 + $0xd8] sm:$0xff]  ;;  %v798_v22 = vld [vmem:[#allocation5 + $0x90] sm:$0xff] }
  0x16   :  { %501 = vmatpush.bf16.msra.mxu3 %v810_v7  ;;  %v806_v23 = vld [vmem:[#allocation5 + $0xd0] sm:$0xff]  ;;  %v781_v24 = vld [vmem:[#allocation5 + $0x8] sm:$0xff]  ;;  %v780_v27 = vld [vmem:[#allocation5] sm:$0xff] }
  0x17   :  { %463 = vmatpush.bf16.msra.mxu0 %v785_v8  ;;  %v789_v25 = vld [vmem:[#allocation5 + $0x48] sm:$0xff]  ;;  %v788_v29 = vld [vmem:[#allocation5 + $0x40] sm:$0xff]  ;;  %v61_v30 = vld [vmem:[#allocation2] sm:$0xff] }
  0x18   :  { %476 = vmatpush.bf16.msra.mxu1 %v793_v9  ;;  %v797_v26 = vld [vmem:[#allocation5 + $0x88] sm:$0xff]  ;;  %v62_v31 = vld [vmem:[#allocation2 + $0x8] sm:$0xff]  ;;  %v796_v34 = vld [vmem:[#allocation5 + $0x80] sm:$0xff]  ;;  %v67_v35 = vpack.c.bf16 %v61_v30, %v61_v30 }
  0x19   :  { %489 = vmatpush.bf16.msra.mxu2 %v801_v10  ;;  %v805_v28 = vld [vmem:[#allocation5 + $0xc8] sm:$0xff]  ;;  %v819_v32 = vld [vmem:[#allocation5 + $0x138] sm:$0xff]  ;;  %v68_v36 = vpack.c.bf16 %v62_v31, %v62_v31  ;;  %v63_v37 = vld [vmem:[#allocation2 + $0x10] sm:$0xff] }
  0x1a   :  { %502 = vmatpush.bf16.msra.mxu3 %v809_v11  ;;  %v827_v33 = vld [vmem:[#allocation5 + $0x178] sm:$0xff]  ;;  %v804_v38 = vld [vmem:[#allocation5 + $0xc0] sm:$0xff]  ;;  %v64_v39 = vld [vmem:[#allocation2 + $0x18] sm:$0xff]  ;;  %v69_v42 = vpack.c.bf16 %v63_v37, %v63_v37 }
  0x1b   :  { %464 = vmatpush.bf16.msra.mxu0 %v784_v12  ;;  %v818_v40 = vld [vmem:[#allocation5 + $0x130] sm:$0xff]  ;;  %v70_v43 = vpack.c.bf16 %v64_v39, %v64_v39  ;;  %v817_v44 = vld [vmem:[#allocation5 + $0x128] sm:$0xff]  ;;  %v816_v46 = vld [vmem:[#allocation5 + $0x120] sm:$0xff] }
  0x1c   :  { %477 = vmatpush.bf16.msra.mxu1 %v792_v13  ;;  %v826_v41 = vld [vmem:[#allocation5 + $0x170] sm:$0xff]  ;;  %v825_v45 = vld [vmem:[#allocation5 + $0x168] sm:$0xff]  ;;  %v824_v47 = vld [vmem:[#allocation5 + $0x160] sm:$0xff] }
  0x1d   :  { %490 = vmatpush.bf16.msra.mxu2 %v800_v14  ;;  %v815_v48 = vld [vmem:[#allocation5 + $0x118] sm:$0xff]  ;;  %v814_v50 = vld [vmem:[#allocation5 + $0x110] sm:$0xff]  ;;  %v813_v52 = vld [vmem:[#allocation5 + $0x108] sm:$0xff] }
  0x1e   :  { %503 = vmatpush.bf16.msra.mxu3 %v808_v15  ;;  %v823_v49 = vld [vmem:[#allocation5 + $0x158] sm:$0xff]  ;;  %v822_v51 = vld [vmem:[#allocation5 + $0x150] sm:$0xff]  ;;  %v821_v53 = vld [vmem:[#allocation5 + $0x148] sm:$0xff] }
  0x1f   :  { %465 = vmatpush.bf16.msra.mxu0 %v783_v16  ;;  %v812_v54 = vld [vmem:[#allocation5 + $0x100] sm:$0xff]  ;;  %v65_v56 = vld [vmem:[#allocation2 + $0x20] sm:$0xff]  ;;  %v66_v57 = vld [vmem:[#allocation2 + $0x28] sm:$0xff] }
  0x20   :  { %478 = vmatpush.bf16.msra.mxu1 %v791_v17  ;;  %v820_v55 = vld [vmem:[#allocation5 + $0x140] sm:$0xff]  ;;  %v71_v58 = vpack.c.bf16 %v65_v56, %v65_v56  ;;  %v72_v59 = vpack.c.bf16 %v66_v57, %v66_v57  ;;  %v543_v11 = vld [vmem:[%s986_s3] sm:$0x3]  ;;  %s942_s3 = smov [#allocation8]  }
  0x21   :  { %491 = vmatpush.bf16.msra.mxu2 %v799_v18  ;;  %v834_v2 = vld [vmem:[#allocation7] ss:$0 sm:$0xff]  ;;  %v546_v14 = vperm.slane %v543_v11, 0  ;;  %v545_v16 = vrot.slane %v543_v11, 1  ;;  %s575_s5 = sshll.u32 %s942_s3, 4  ;;  %s576_s5 = int_to_ptr.vmem [resolvable:$true] %s575_s5 }
  0x22   :  { %504 = vmatpush.bf16.msra.mxu3 %v807_v19 }
  0x23   :  { %466 = vmatpush.bf16.msra.mxu0 %v782_v20 }
  0x24   :  { %479 = vmatpush.bf16.msra.mxu1 %v790_v21 }
  0x25   :  { %492 = vmatpush.bf16.msra.mxu2 %v798_v22  ;;  %v547_v22 = vperm.slane %v545_v16, 0 }
  0x26   :  { %505 = vmatpush.bf16.msra.mxu3 %v806_v23 }
  0x27   :  { %467 = vmatpush.bf16.msra.mxu0 %v781_v24 }
  0x28   :  { %480 = vmatpush.bf16.msra.mxu1 %v789_v25 }
  0x29   :  { %493 = vmatpush.bf16.msra.mxu2 %v797_v26  ;;  %v561_v26 = vlaneseq }
  0x2a   :  { %506 = vmatpush.bf16.msra.mxu3 %v805_v28 }
  0x2b   :  { %468 = vmatpush.bf16.msra.mxu0 %v780_v27  ;;  %v562_v27 = vand.u32 127, %v561_v26 }
  0x2c   :  { %481 = vmatpush.bf16.msra.mxu1 %v788_v29 }
  0x2d   :  { %494 = vmatpush.bf16.msra.mxu2 %v796_v34 }
  0x2e   :  { %469 = vmatmul.bf16.vlgmr.msra.gmra.mxu0 %v67_v35  ;;  %507 = vmatpush.bf16.msra.mxu3 %v804_v38 }
  0x2f   :  { %513 = vmatpush.bf16.msrb.mxu0 %v819_v32  ;;  %482 = vmatmul.bf16.vlgmr.msra.gmra.mxu1 %v68_v36 }
  0x30   :  { %526 = vmatpush.bf16.msrb.mxu1 %v827_v33  ;;  %495 = vmatmul.bf16.vlgmr.msra.gmra.mxu2 %v69_v42 }
  0x31   :  { %508 = vmatmul.bf16.vlgmr.msra.gmra.mxu3 %v70_v43 }
  0x33   :  { %514 = vmatpush.bf16.msrb.mxu0 %v818_v40 }
  0x34   :  { %527 = vmatpush.bf16.msrb.mxu1 %v826_v41 }
  0x37   :  { %515 = vmatpush.bf16.msrb.mxu0 %v817_v44 }
  0x38   :  { %528 = vmatpush.bf16.msrb.mxu1 %v825_v45 }
  0x3b   :  { %516 = vmatpush.bf16.msrb.mxu0 %v816_v46 }
  0x3c   :  { %529 = vmatpush.bf16.msrb.mxu1 %v824_v47 }
  0x3f   :  { %517 = vmatpush.bf16.msrb.mxu0 %v815_v48 }
  0x40   :  { %530 = vmatpush.bf16.msrb.mxu1 %v823_v49 }
  0x43   :  { %518 = vmatpush.bf16.msrb.mxu0 %v814_v50 }
  0x44   :  { %531 = vmatpush.bf16.msrb.mxu1 %v822_v51 }
  0x47   :  { %519 = vmatpush.bf16.msrb.mxu0 %v813_v52 }
  0x48   :  { %532 = vmatpush.bf16.msrb.mxu1 %v821_v53 }
  0x4b   :  { %520 = vmatpush.bf16.msrb.mxu0 %v812_v54 }
  0x4c   :  { %533 = vmatpush.bf16.msrb.mxu1 %v820_v55 }
  0x4e   :  { %521 = vmatmul.bf16.vlgmr.msrb.gmra.mxu0 %v71_v58 }
  0x4f   :  { %534 = vmatmul.bf16.vlgmr.msrb.gmra.mxu1 %v72_v59 }
  0xab   :  { %v470_v60 = vpop.f32.mrf.mxu0 }
  0xac   :  { %v483_v61 = vpop.f32.mrf.mxu1  ;;  %v471_v3 = vadd.f32 %v834_v2, %v470_v60 }
  0xae   :  { %v484_v6 = vadd.f32 %v483_v61, %v471_v3 }
  0xb3   :  { %v472_v62 = vpop.f32.mrf.mxu0  ;;  %v496_v0 = vpop.f32.mrf.mxu2 }
  0xb4   :  { %v485_v63 = vpop.f32.mrf.mxu1  ;;  %v509_v1 = vpop.f32.mrf.mxu3  ;;  %v497_v7 = vadd.f32 %v496_v0, %v484_v6 }
  0xb6   :  { %v510_v8 = vadd.f32 %v509_v1, %v497_v7 }
  0xbb   :  { %v498_v4 = vpop.f32.mrf.mxu2 }
  0xbc   :  { %v511_v5 = vpop.f32.mrf.mxu3 }
  0xcb   :  { %v522_v9 = vpop.f32.mrf.mxu0 }
  0xcc   :  { %v535_v10 = vpop.f32.mrf.mxu1  ;;  %v523_v12 = vadd.f32 %v522_v9, %v510_v8 }
  0xce   :  { %v536_v13 = vadd.f32 %v535_v10, %v523_v12 }
  0xd0   :  { %v539_v15 = vmax.f32 %v536_v13, 0.0 }
  0xd2   :  { %v550_v17 = vmul.f32 %v546_v14, %v539_v15  ;;  %v541_v20 = vrot.slane %v539_v15, 4 }
  0xd3   :  { %v524_v18 = vpop.f32.mrf.mxu0 }
  0xd4   :  { %v537_v19 = vpop.f32.mrf.mxu1  ;;  %v553_v21 = vsel %vm552_vm0, %v550_v17, 0.0  ;;  %v551_v23 = vmul.f32 %v547_v22, %v541_v20 }
  0xd5   :  { %554 = vadd.xlane.f32.xlu0 %v553_v21 }
  0xd6   :  { %v556_v24 = vsel %vm552_vm0, %v551_v23, 0.0 }
  0xdd   :  { %557 = vadd.xlane.f32.xlu0 %v556_v24 }
 0x148   :  { %v555_v25 = vpop.xlane.xlu0 %554 }
 0x149   :  { %v563_v29 = vperm.slane %v555_v25, %v562_v27 }
 0x150   :  { %v558_v28 = vpop.xlane.xlu0 %557 }
 0x151   :  { %v564_v30 = vperm.slane %v558_v28, %v562_v27 }
 0x153   :  { %v566_v31 = vsel %vm565_vm1, %v564_v30, %v563_v29 }
 0x154   :  { %569 = vst.msk [vmem:[#allocation8] sm:$0x3] %vm568_vm2, %v566_v31 }
 0x155   :  { %580 = dma.vmem_to_hbm [thread:$0]  %s576_s5, 32, %s578_s8, [#allocation4]  }
 0x156   :  { %935 = dma.done.wait [#allocation4], 32  }
 0x157   :  { %936 = vsyncadd [#allocation4], 4294967264 }
 0x158   :  { %585 = vsyncpa [#allocation3], 1 }
 0x159   :  { %586 = vsyncpa [#allocation6], 1 }
 0x15a   :  { %587 = vsyncpa [#allocation4], 1 }

</bundles_post_ra>
